<compile_context>
chip_gen: v6e
topology: v6e:2x2x1
jax: 0.10.0
libtpu: 0.0.40
codegen_flags: <defaults>
</compile_context>

<pallas_src>
import functools

import jax
import jax.numpy as jnp
from jax.experimental import pallas as pl
from jax.experimental.pallas import tpu as pltpu


# ---------------------------------------------------------------------------
# Pass 1: im2col'd transposed conv (ONE MXU matmul / tile) + streamed BN stats.
# ---------------------------------------------------------------------------
def _convt_stats_kernel(x_ref, w_ref, y_ref, stats_ref):
    # x_ref    : (1, rows, Kc)  bf16   im2col patches, Kc = union^2 * Cin
    # w_ref    : (Kc, Pc)       bf16   folded weight,  Pc = stride^2 * Cout
    # y_ref    : (1, rows, Pc)  bf16   pre-BN conv-transpose output
    # stats_ref: (1, 2, Pc)     f32    per-lane [sum, sum_of_squares]
    y = jnp.dot(x_ref[0], w_ref[...], preferred_element_type=jnp.float32)
    # BN statistics from the f32 accumulator, BEFORE the bf16 store.
    stats_ref[0, 0] = jnp.sum(y, axis=0)
    stats_ref[0, 1] = jnp.sum(y * y, axis=0)
    y_ref[0] = y.astype(y_ref.dtype)


# ---------------------------------------------------------------------------
# Pass 2: apply folded BatchNorm (one FMA) + ReLU, in place (bf16 <-> bf16).
# ---------------------------------------------------------------------------
def _bn_relu_kernel(y_ref, scale_ref, shift_ref, o_ref):
    y = y_ref[0].astype(jnp.float32)
    o_ref[0] = jnp.maximum(y * scale_ref[...] + shift_ref[...], 0.0
                           ).astype(o_ref.dtype)


# ---------------------------------------------------------------------------
# Per-generation VMEM budget / tile sizing.
# ---------------------------------------------------------------------------
def _vmem_limit_bytes():
    """VMEM limit re-derived per TPU generation (v5e/v6e: 128 MiB physical,
    v7x: 64 MiB per core); keep ~1/4 headroom for Mosaic internals."""
    try:
        cap = int(pltpu.get_tpu_info().vmem_capacity_bytes)
    except Exception:  # pragma: no cover - conservative default (v7x-sized)
        cap = 64 << 20
    return max(32 << 20, min(cap * 3 // 4, 96 << 20))


def _pick_row_tile(hq, wq, kc, pc, budget_bytes, cap=None):
    """Largest divisor of hq whose pass-1 working set fits the VMEM budget.

    Per coarse output row: double-buffered bf16 patches + double-buffered
    bf16 output + the live f32 matmul result.
    """
    per_row = wq * (2 * kc * 2 + 2 * pc * 2 + pc * 4)
    t = max(1, min(hq, budget_bytes // max(per_row, 1)))
    if cap is not None:
        t = min(t, max(1, cap))
    while hq % t:
        t -= 1
    return t


# ---------------------------------------------------------------------------
# Wrapper: geometry, weight folding, im2col, two pallas_call passes.
# ---------------------------------------------------------------------------
def conv_transpose2d_block(x_nchw, weight, gamma, beta, *, stride, padding,
                           eps=1e-5, row_block=None):
    """ConvTranspose2d(bias=False) -> BatchNorm2d(train) -> ReLU.  NCHW in/out.

    x_nchw : (N, Cin, H, W)
    weight : (Cin, Cout, K, K)   -- PyTorch ConvTranspose2d layout
    gamma, beta : (Cout,)
    returns (N, Cout, Ho, Wo),  Ho = (H-1)*stride - 2*padding + K
    """
    n, cin, h, w = x_nchw.shape
    cin_w, cout, k, k2 = weight.shape
    assert cin == cin_w and k == k2
    s, p = int(stride), int(padding)
    ho = (h - 1) * s - 2 * p + k
    wo = (w - 1) * s - 2 * p + k
    assert ho > 0 and wo > 0

    # ---- static sub-pixel (phase) geometry --------------------------------
    # TODO(synk): configs with K % stride != 0 or (K - 2*pad) % stride != 0
    # need per-phase zero taps / output cropping; standard DCGAN/WGAN blocks
    # (k=4, s=2, p=1) satisfy these constraints.
    assert k % s == 0 and (k - 2 * p) % s == 0, "unsupported (k, stride, pad)"
    taps = k // s
    kh_sets, bases = [], []
    for r in range(s):
        kmax = ((r + p) % s) + s * (taps - 1)
        kh_sets.append([kmax - a * s for a in range(taps)])   # decreasing kh
        bases.append((r + p - kmax) // s)                     # input offset base
    min_b = min(bases)
    shifts = [b - min_b for b in bases]          # per-phase offset in the window
    union = (max(bases) + taps - 1) - min_b + 1  # coarse rows touched per pixel
    hq, wq = ho // s, wo // s
    pad_lo = -min_b
    pad_hi_h = hq + union - 1 - h - pad_lo
    pad_hi_w = wq + union - 1 - w - pad_lo
    assert pad_lo >= 0 and pad_hi_h >= 0 and pad_hi_w >= 0, \
        "unsupported padding geometry"   # TODO(synk): crop-style geometries

    kc = union * union * cin                     # matmul contraction depth
    pc = s * s * cout                            # phase-interleaved lanes

    # ---- tile sizing against this generation's VMEM -----------------------
    vmem_limit = _vmem_limit_bytes()
    th = _pick_row_tile(hq, wq, kc, pc, budget_bytes=vmem_limit // 4,
                        cap=row_block)
    n_row_tiles = hq // th
    # keep the "parallel" grid even so both v7x TensorCores get work
    if (n * n_row_tiles) % 2 == 1 and th % 2 == 0:
        th //= 2
        n_row_tiles = hq // th
    n_tiles = n * n_row_tiles
    rows = th * wq                               # matmul M per tile

    # ---- weight folding: (Cin,Cout,K,K) -> (union^2*Cin, s^2*Cout), bf16 --
    # Tap accumulation folded into the MXU contraction: zero rows for
    # (phase, offset) pairs that phase does not use.  Static per layer —
    # hoist / cache in real use (negligible here).
    wf = jnp.zeros((union, union, cin, s, s, cout), jnp.float32)
    for rh in range(s):
        for a in range(taps):
            for rw in range(s):
                for b in range(taps):
                    tap = weight[:, :, kh_sets[rh][a], kh_sets[rw][b]]
                    wf = wf.at[shifts[rh] + a, shifts[rw] + b, :, rh, rw, :].set(
                        tap.astype(jnp.float32))
    w_fold = wf.reshape(kc, pc).astype(jnp.bfloat16)

    # ---- im2col over the union x union coarse window, bf16 ----------------
    # TODO(synk): for production-sized layers move this halo gather in-kernel
    # (memory_space=pl.ANY input + make_async_copy of halo'd windows) to avoid
    # the union^2 input duplication through HBM; at generator shapes the input
    # is tiny relative to the output, so the wrapper-side form is the
    # low-risk, XLA-fusable one.
    x = jnp.transpose(x_nchw, (0, 2, 3, 1)).astype(jnp.bfloat16)        # NHWC
    xp = jnp.pad(x, ((0, 0), (pad_lo, pad_hi_h), (pad_lo, pad_hi_w), (0, 0)))
    cols = [xp[:, du:du + hq, dv:dv + wq, :]
            for du in range(union) for dv in range(union)]
    patches = jnp.concatenate(cols, axis=-1)                # (n, hq, wq, kc)
    xt = patches.reshape(n, n_row_tiles, th, wq, kc).reshape(n_tiles, rows, kc)

    cparams = pltpu.CompilerParams(
        dimension_semantics=("parallel",),       # shards tiles on v7x's 2 TCs
        vmem_limit_bytes=vmem_limit)

    # ---- pass 1: ONE lane-dense MXU matmul per tile + BN statistics -------
    y_pre, stats = pl.pallas_call(
        _convt_stats_kernel,
        grid=(n_tiles,),
        in_specs=[pl.BlockSpec((1, rows, kc), lambda i: (i, 0, 0)),
                  # grid-invariant weight: constant index map, fetched once;
                  # its double-buffer costs only 2*Kc*Pc*2 bytes of VMEM.
                  pl.BlockSpec((kc, pc), lambda i: (0, 0))],
        out_specs=[pl.BlockSpec((1, rows, pc), lambda i: (i, 0, 0)),
                   pl.BlockSpec((1, 2, pc), lambda i: (i, 0, 0))],
        out_shape=[jax.ShapeDtypeStruct((n_tiles, rows, pc), jnp.bfloat16),
                   jax.ShapeDtypeStruct((n_tiles, 2, pc), jnp.float32)],
        compiler_params=cparams,
    )(xt, w_fold)

    # ---- fold BN: tiny cross-tile reduction + gamma/beta fold (plain JAX) --
    count = n * ho * wo
    tot = jnp.sum(stats, axis=0)                        # (2, pc)
    ch_sum = tot[0].reshape(s * s, cout).sum(axis=0)
    ch_sumsq = tot[1].reshape(s * s, cout).sum(axis=0)
    mean = ch_sum / count
    # Single-pass (E[x^2] - mean^2) variance in f32: fine at WGAN activation
    # scales.  TODO(synk): use a centered / Welford-style reduction if this
    # block is used with |mean| >> std or very large N*Ho*Wo.
    var = jnp.maximum(ch_sumsq / count - mean * mean, 0.0)
    scale = gamma.astype(jnp.float32) * jax.lax.rsqrt(var + eps)
    shift = beta.astype(jnp.float32) - mean * scale
    scale_v = jnp.tile(scale, s * s).reshape(1, pc)     # phase-interleaved order
    shift_v = jnp.tile(shift, s * s).reshape(1, pc)

    # ---- pass 2: normalize + ReLU, in place (bf16 I/O, f32 math) ----------
    y_out = pl.pallas_call(
        _bn_relu_kernel,
        grid=(n_tiles,),
        in_specs=[pl.BlockSpec((1, rows, pc), lambda i: (i, 0, 0)),
                  pl.BlockSpec((1, pc), lambda i: (0, 0)),
                  pl.BlockSpec((1, pc), lambda i: (0, 0))],
        out_specs=pl.BlockSpec((1, rows, pc), lambda i: (i, 0, 0)),
        out_shape=jax.ShapeDtypeStruct((n_tiles, rows, pc), jnp.bfloat16),
        input_output_aliases={0: 0},            # reuse y_pre's HBM buffer
        compiler_params=cparams,
    )(y_pre, scale_v, shift_v)

    # ---- pixel shuffle + NCHW: one fused XLA transpose on bf16, cast f32 --
    # TODO(synk): if the consumer accepts the phase-interleaved
    # (tile, row, s*s*Cout) layout (e.g. the next generator block), this final
    # transpose can be dropped entirely.
    y6 = y_out.reshape(n, n_row_tiles, th, wq, s, s, cout)
    out = jnp.transpose(y6, (0, 6, 1, 2, 4, 3, 5)).astype(jnp.float32)
    return out.reshape(n, cout, ho, wo)
    # TODO(synk): BatchNorm2d running_mean/running_var buffer updates are a
    # training-time state mutation and are not produced here (forward output
    # is unaffected).


# ---------------------------------------------------------------------------
# Pure-JAX f32 reference for the correctness check.
# ---------------------------------------------------------------------------
def _reference(x_nchw, weight, gamma, beta, *, stride, padding, eps=1e-5):
    cin, cout, k, _ = weight.shape
    pad = k - 1 - padding
    rhs = jnp.transpose(weight, (1, 0, 2, 3))[:, :, ::-1, ::-1]  # OIHW, flipped
    y = jax.lax.conv_general_dilated(
        x_nchw.astype(jnp.float32), rhs.astype(jnp.float32),
        window_strides=(1, 1), padding=((pad, pad), (pad, pad)),
        lhs_dilation=(stride, stride),
        dimension_numbers=('NCHW', 'OIHW', 'NCHW'))
    mean = jnp.mean(y, axis=(0, 2, 3), keepdims=True)
    var = jnp.mean((y - mean) ** 2, axis=(0, 2, 3), keepdims=True)
    y = (y - mean) * jax.lax.rsqrt(var + eps)
    y = y * gamma.reshape(1, cout, 1, 1) + beta.reshape(1, cout, 1, 1)
    return jnp.maximum(y, 0.0)


if __name__ == "__main__":
    # Small WGAN-generator-like block: Cin=8 -> Cout=32, k=4, stride=2, pad=1.
    # (s^2 * Cout = 128 -> lane-dense output blocks even at this small size.)
    N, Cin, H, W = 2, 8, 16, 16
    Cout, K, STRIDE, PAD = 32, 4, 2, 1

    key = jax.random.PRNGKey(0)
    kx, kw, kg, kb = jax.random.split(key, 4)
    x = jax.random.normal(kx, (N, Cin, H, W), jnp.float32)           # NCHW
    weight = 0.1 * jax.random.normal(kw, (Cin, Cout, K, K), jnp.float32)
    gamma = 1.0 + 0.1 * jax.random.normal(kg, (Cout,), jnp.float32)
    beta = 0.1 * jax.random.normal(kb, (Cout,), jnp.float32)

    fwd = jax.jit(functools.partial(conv_transpose2d_block,
                                    stride=STRIDE, padding=PAD))
    out = jax.block_until_ready(fwd(x, weight, gamma, beta))

    Ho = (H - 1) * STRIDE - 2 * PAD + K
    assert out.shape == (N, Cout, Ho, Ho), out.shape

    ref = _reference(x, weight, gamma, beta, stride=STRIDE, padding=PAD)
    # bf16 MXU inputs + bf16 y_pre storage (per perf review) vs an f32
    # reference; post-BN outputs are O(1) so 6e-2 absolute is a real check.
    err = float(jnp.max(jnp.abs(out - ref)))
    assert err < 6e-2, err

    print("KERNEL_OK")
</pallas_src>

<mosaic_0001>
module attributes {stable_mosaic.version = 11 : i64} {
  func.func @_convt_stats_kernel(%arg0: i32, %arg1: memref<1x256x72xbf16, #tpu.memory_space<vmem>>, %arg2: memref<72x128xbf16, #tpu.memory_space<vmem>>, %arg3: memref<1x256x128xbf16, #tpu.memory_space<vmem>>, %arg4: memref<1x2x128xf32, #tpu.memory_space<vmem>>) attributes {dimension_semantics = [#tpu.dimension_semantics<parallel>], iteration_bounds = array<i64: 2>, scalar_prefetch = 0 : i64, scratch_operands = 0 : i64, tpu.core_type = #tpu.core_type<tc>, window_params = [{transform_indices = @transform_0, window_bounds = array<i64: 1, 256, 72>}, {pipeline_mode = #tpu.pipeline_mode<synchronous>, transform_indices = @transform_1, window_bounds = array<i64: 72, 128>}, {transform_indices = @transform_2, window_bounds = array<i64: 1, 256, 128>}, {transform_indices = @transform_3, window_bounds = array<i64: 1, 2, 128>}]} {
    %c0 = arith.constant 0 : index
    %c0_0 = arith.constant 0 : index
    %c0_1 = arith.constant 0 : index
    %0 = vector.load %arg1[%c0, %c0_0, %c0_1] : memref<1x256x72xbf16, #tpu.memory_space<vmem>>, vector<1x256x72xbf16>
    %1 = vector.shape_cast %0 : vector<1x256x72xbf16> to vector<256x72xbf16>
    %c0_2 = arith.constant 0 : index
    %c0_3 = arith.constant 0 : index
    %2 = vector.load %arg2[%c0_2, %c0_3] : memref<72x128xbf16, #tpu.memory_space<vmem>>, vector<72x128xbf16>
    %cst = arith.constant dense<0.000000e+00> : vector<256x128xf32>
    %3 = tpu.matmul %1, %2, %cst {dimension_numbers = #tpu.dot_dimension_numbers<[1], [0], [0], [1], [0, 0, 1, 1], [], []>} : vector<256x72xbf16>, vector<72x128xbf16>, vector<256x128xf32> -> vector<256x128xf32>
    %cst_4 = arith.constant dense<0.000000e+00> : vector<128xf32>
    %4 = vector.multi_reduction <add>, %3, %cst_4 [0] : vector<256x128xf32> to vector<128xf32>
    %c0_5 = arith.constant 0 : index
    %c0_6 = arith.constant 0 : index
    %c0_7 = arith.constant 0 : index
    %5 = vector.load %arg4[%c0_5, %c0_6, %c0_7] : memref<1x2x128xf32, #tpu.memory_space<vmem>>, vector<1x1x128xf32>
    %6 = vector.shape_cast %5 : vector<1x1x128xf32> to vector<128xf32>
    %7 = vector.shape_cast %4 : vector<128xf32> to vector<1x1x128xf32>
    tpu.vector_store %arg4[%c0_5, %c0_6, %c0_7], %7 {strides = array<i32>} : memref<1x2x128xf32, #tpu.memory_space<vmem>>, vector<1x1x128xf32>,
    %8 = arith.mulf %3, %3 : vector<256x128xf32>
    %cst_8 = arith.constant dense<0.000000e+00> : vector<128xf32>
    %9 = vector.multi_reduction <add>, %8, %cst_8 [0] : vector<256x128xf32> to vector<128xf32>
    %c0_9 = arith.constant 0 : index
    %c1 = arith.constant 1 : index
    %c0_10 = arith.constant 0 : index
    %10 = vector.load %arg4[%c0_9, %c1, %c0_10] : memref<1x2x128xf32, #tpu.memory_space<vmem>>, vector<1x1x128xf32>
    %11 = vector.shape_cast %10 : vector<1x1x128xf32> to vector<128xf32>
    %12 = vector.shape_cast %9 : vector<128xf32> to vector<1x1x128xf32>
    tpu.vector_store %arg4[%c0_9, %c1, %c0_10], %12 {strides = array<i32>} : memref<1x2x128xf32, #tpu.memory_space<vmem>>, vector<1x1x128xf32>,
    %13 = arith.truncf %3 : vector<256x128xf32> to vector<256x128xbf16>
    %c0_11 = arith.constant 0 : index
    %c0_12 = arith.constant 0 : index
    %c0_13 = arith.constant 0 : index
    %14 = vector.load %arg3[%c0_11, %c0_12, %c0_13] : memref<1x256x128xbf16, #tpu.memory_space<vmem>>, vector<1x256x128xbf16>
    %15 = vector.shape_cast %14 : vector<1x256x128xbf16> to vector<256x128xbf16>
    %16 = vector.shape_cast %13 : vector<256x128xbf16> to vector<1x256x128xbf16>
    tpu.vector_store %arg3[%c0_11, %c0_12, %c0_13], %16 {strides = array<i32>} : memref<1x256x128xbf16, #tpu.memory_space<vmem>>, vector<1x256x128xbf16>,
    return
  }
  func.func @transform_0(%arg0: i32) -> (i32, i32, i32) {
    %c0_i32 = arith.constant 0 : i32
    %c0_i32_0 = arith.constant 0 : i32
    %c0_i32_1 = arith.constant 0 : i32
    return %arg0, %c0_i32, %c0_i32_0 : i32, i32, i32
  }
  func.func @transform_1(%arg0: i32) -> (i32, i32) {
    %c0_i32 = arith.constant 0 : i32
    %c0_i32_0 = arith.constant 0 : i32
    %c0_i32_1 = arith.constant 0 : i32
    return %c0_i32, %c0_i32_0 : i32, i32
  }
  func.func @transform_2(%arg0: i32) -> (i32, i32, i32) {
    %c0_i32 = arith.constant 0 : i32
    %c0_i32_0 = arith.constant 0 : i32
    %c0_i32_1 = arith.constant 0 : i32
    return %arg0, %c0_i32, %c0_i32_0 : i32, i32, i32
  }
  func.func @transform_3(%arg0: i32) -> (i32, i32, i32) {
    %c0_i32 = arith.constant 0 : i32
    %c0_i32_0 = arith.constant 0 : i32
    %c0_i32_1 = arith.constant 0 : i32
    return %arg0, %c0_i32, %c0_i32_0 : i32, i32, i32
  }
}

module attributes {stable_mosaic.version = 11 : i64} {
  func.func @_bn_relu_kernel(%arg0: i32, %arg1: memref<1x256x128xbf16, #tpu.memory_space<vmem>>, %arg2: memref<1x128xf32, #tpu.memory_space<vmem>>, %arg3: memref<1x128xf32, #tpu.memory_space<vmem>>, %arg4: memref<1x256x128xbf16, #tpu.memory_space<vmem>>) attributes {dimension_semantics = [#tpu.dimension_semantics<parallel>], iteration_bounds = array<i64: 2>, scalar_prefetch = 0 : i64, scratch_operands = 0 : i64, tpu.core_type = #tpu.core_type<tc>, window_params = [{transform_indices = @transform_0, window_bounds = array<i64: 1, 256, 128>}, {pipeline_mode = #tpu.pipeline_mode<synchronous>, transform_indices = @transform_1, window_bounds = array<i64: 1, 128>}, {pipeline_mode = #tpu.pipeline_mode<synchronous>, transform_indices = @transform_2, window_bounds = array<i64: 1, 128>}, {transform_indices = @transform_3, window_bounds = array<i64: 1, 256, 128>}]} {
    %c0 = arith.constant 0 : index
    %c0_0 = arith.constant 0 : index
    %c0_1 = arith.constant 0 : index
    %0 = vector.load %arg1[%c0, %c0_0, %c0_1] : memref<1x256x128xbf16, #tpu.memory_space<vmem>>, vector<1x256x128xbf16>
    %1 = vector.shape_cast %0 : vector<1x256x128xbf16> to vector<256x128xbf16>
    %2 = arith.extf %1 : vector<256x128xbf16> to vector<256x128xf32>
    %c0_2 = arith.constant 0 : index
    %c0_3 = arith.constant 0 : index
    %3 = vector.load %arg2[%c0_2, %c0_3] : memref<1x128xf32, #tpu.memory_space<vmem>>, vector<1x128xf32>
    %4 = vector.broadcast %3 : vector<1x128xf32> to vector<256x128xf32>
    %5 = arith.mulf %2, %4 : vector<256x128xf32>
    %c0_4 = arith.constant 0 : index
    %c0_5 = arith.constant 0 : index
    %6 = vector.load %arg3[%c0_4, %c0_5] : memref<1x128xf32, #tpu.memory_space<vmem>>, vector<1x128xf32>
    %7 = vector.broadcast %6 : vector<1x128xf32> to vector<256x128xf32>
    %8 = arith.addf %5, %7 : vector<256x128xf32>
    %cst = arith.constant 0.000000e+00 : f32
    %9 = vector.broadcast %cst : f32 to vector<256x128xf32>
    %10 = arith.maximumf %8, %9 : vector<256x128xf32>
    %11 = arith.truncf %10 : vector<256x128xf32> to vector<256x128xbf16>
    %c0_6 = arith.constant 0 : index
    %c0_7 = arith.constant 0 : index
    %c0_8 = arith.constant 0 : index
    %12 = vector.load %arg4[%c0_6, %c0_7, %c0_8] : memref<1x256x128xbf16, #tpu.memory_space<vmem>>, vector<1x256x128xbf16>
    %13 = vector.shape_cast %12 : vector<1x256x128xbf16> to vector<256x128xbf16>
    %14 = vector.shape_cast %11 : vector<256x128xbf16> to vector<1x256x128xbf16>
    tpu.vector_store %arg4[%c0_6, %c0_7, %c0_8], %14 {strides = array<i32>} : memref<1x256x128xbf16, #tpu.memory_space<vmem>>, vector<1x256x128xbf16>,
    return
  }
  func.func @transform_0(%arg0: i32) -> (i32, i32, i32) {
    %c0_i32 = arith.constant 0 : i32
    %c0_i32_0 = arith.constant 0 : i32
    %c0_i32_1 = arith.constant 0 : i32
    return %arg0, %c0_i32, %c0_i32_0 : i32, i32, i32
  }
  func.func @transform_1(%arg0: i32) -> (i32, i32) {
    %c0_i32 = arith.constant 0 : i32
    %c0_i32_0 = arith.constant 0 : i32
    %c0_i32_1 = arith.constant 0 : i32
    return %c0_i32, %c0_i32_0 : i32, i32
  }
  func.func @transform_2(%arg0: i32) -> (i32, i32) {
    %c0_i32 = arith.constant 0 : i32
    %c0_i32_0 = arith.constant 0 : i32
    %c0_i32_1 = arith.constant 0 : i32
    return %c0_i32, %c0_i32_0 : i32, i32
  }
  func.func @transform_3(%arg0: i32) -> (i32, i32, i32) {
    %c0_i32 = arith.constant 0 : i32
    %c0_i32_0 = arith.constant 0 : i32
    %c0_i32_1 = arith.constant 0 : i32
    return %arg0, %c0_i32, %c0_i32_0 : i32, i32, i32
  }
}

</mosaic_0001>

<bundles_post_ra>
// kernel: squeeze.34
= control target key start
LH: loop header
LB: loop body
LE: loop exit
PB: predicated region body
PF: predicated region fallthrough
CT: control target
= control target key end

     0   :  { %s40_s8 = smov 32   ;;  %vm8_vm0 = vcmask 261120   ;;  %s41_s9 = smov 64   ;;  %s58_s0 = inlined_call_operand.vmem [shape: f32[128], index: 0, kind: input, shape index: {}]   ;;  %s59_s1 = inlined_call_operand.vmem [shape: f32[4,32], index: 1, kind: output, shape index: {}]  }
   0x1   :  { %v5_v0 = vld [vmem:[%s58_s0] sm:$0x1]  ;;  %s39_s0 = smov 96  }
   0x2   :  { %6 = vst [vmem:[#allocation1] sm:$0x1] %v5_v0 }
   0x9   :  { %v10_v1 = vld [vmem:[#allocation1] sm:$0x1]  }
   0xa   :  { %v22_v2 = vld [vmem:[#allocation1] sm:$0x1]   ;;  %11 = vrot.lane.b32.xlu0 %v10_v1, %s39_s0 }
   0xb   :  { %23 = vrot.lane.b32.xlu1 %v22_v2, %s40_s8  ;;  %v7_v3 = vld [vmem:[#allocation1] sm:$0x1]  }
   0xc   :  { %v16_v4 = vld [vmem:[#allocation1] sm:$0x1]   ;;  %9 = vst.msk [vmem:[#allocation0] sm:$0x1] %vm8_vm0, %v7_v3  }
   0xe   :  { %17 = vrot.lane.b32.xlu0 %v16_v4, %s41_s9 }
  0x7c   :  { %v12_v5 = vpop.permute.xlu0 %11  }
  0x7d   :  { %v24_v6 = vpop.permute.xlu1 %23   ;;  %15 = vst.msk [vmem:[#allocation0 + $0x1] sm:$0x1] %vm8_vm0, %v12_v5  }
  0x7e   :  { %27 = vst.msk [vmem:[#allocation0 + $0x3] sm:$0x1] %vm8_vm0, %v24_v6  }
  0x80   :  { %v18_v7 = vpop.permute.xlu0 %17  }
  0x81   :  { %21 = vst.msk [vmem:[#allocation0 + $0x2] sm:$0x1] %vm8_vm0, %v18_v7  }
  0x88   :  { %v32_v8 = vld [vmem:[#allocation0] sm:$0xf] }
  0x89   :  { %35 = vst [vmem:[%s59_s1] sm:$0xf] %v32_v8 }

// kernel: tile.18
= control target key start
LH: loop header
LB: loop body
LE: loop exit
PB: predicated region body
PF: predicated region fallthrough
CT: control target
= control target key end

     0   :  { %s22_s0 = inlined_call_operand.vmem [shape: f32[32], index: 0, kind: input, shape index: {}]   ;;  %s23_s1 = inlined_call_operand.vmem [shape: f32[4,32], index: 1, kind: output, shape index: {}]  }
   0x1   :  { %v4_v0 = vld [vmem:[%s22_s0] ss:$0 sm:$0xff] }
   0x2   :  { %5 = vst [vmem:[%s23_s1] sm:$0xf] %v4_v0 }

// kernel: tile.19
= control target key start
LH: loop header
LB: loop body
LE: loop exit
PB: predicated region body
PF: predicated region fallthrough
CT: control target
= control target key end

     0   :  { %vm8_vm0 = vcmask 261120   ;;  %s40_s8 = smov 32   ;;  %s41_s9 = smov 64   ;;  %vm14_vm1 = vcmask 1048320   ;;  %vm20_vm2 = vcmask 785920   ;;  %vm26_vm3 = vcmask 523520   ;;  %s58_s0 = inlined_call_operand.vmem [shape: f32[4,32], index: 0, kind: input, shape index: {}]   ;;  %s59_s1 = inlined_call_operand.vmem [shape: f32[1,128], index: 1, kind: output, shape index: {}]  }
   0x1   :  { %v5_v0 = vld [vmem:[%s58_s0] sm:$0xf]  ;;  %s39_s0 = smov 96  }
   0x2   :  { %6 = vst [vmem:[#allocation1] sm:$0xf] %v5_v0 }
   0x9   :  { %v11_v1 = vld [vmem:[#allocation1 + $0x3] sm:$0x1]   ;;  %v23_v2 = vld [vmem:[#allocation1 + $0x1] sm:$0x1]   ;;  %v7_v3 = vld [vmem:[#allocation1] sm:$0x1]  }
   0xa   :  { %12 = vrot.lane.b32.xlu0 %v11_v1, %s39_s0  ;;  %24 = vrot.lane.b32.xlu1 %v23_v2, %s40_s8  ;;  %v17_v4 = vld [vmem:[#allocation1 + $0x2] sm:$0x1]   ;;  %9 = vst.msk [vmem:[#allocation0] sm:$0x1] %vm8_vm0, %v7_v3  }
   0xe   :  { %18 = vrot.lane.b32.xlu0 %v17_v4, %s41_s9 }
  0x7c   :  { %v13_v5 = vpop.permute.xlu0 %12   ;;  %v25_v6 = vpop.permute.xlu1 %24  }
  0x7d   :  { %15 = vst.msk [vmem:[#allocation0] sm:$0x1] %vm14_vm1, %v13_v5  }
  0x80   :  { %v19_v7 = vpop.permute.xlu0 %18  }
  0x81   :  { %21 = vst.msk [vmem:[#allocation0] sm:$0x1] %vm20_vm2, %v19_v7  }
  0x82   :  { %27 = vst.msk [vmem:[#allocation0] sm:$0x1] %vm26_vm3, %v25_v6  }
  0x89   :  { %v32_v8 = vld [vmem:[#allocation0] sm:$0x1] }
  0x8a   :  { %35 = vst [vmem:[%s59_s1] sm:$0x1] %v32_v8 }

// kernel: conv_transpose2d_block.3
= control target key start
LH: loop header
LB: loop body
LE: loop exit
PB: predicated region body
PF: predicated region fallthrough
CT: control target
= control target key end

     0   :  { %s849_s12 = smov 0   ;;  %s991_s0 = inlined_call_operand.vmem [shape: bf16[2,256,128], index: 0, kind: input, shape index: {}, may-alias: {0,3}]   ;;  %s992_s1 = inlined_call_operand.vmem [shape: f32[1,128], index: 1, kind: input, shape index: {}]   ;;  %s993_s2 = inlined_call_operand.vmem [shape: f32[1,128], index: 2, kind: input, shape index: {}]   ;;  %s994_s3 = inlined_call_operand.vmem [shape: bf16[2,256,128], index: 3, kind: output, shape index: {}, may-alias: {0,3}]  }
   0x1 LB: > { %s560_s13 = sadd.s32 4294967295, %s827_s12   ;;  %p564_p0 = scmp.ge.s32.totalorder %s827_s12, 1  ;;  %s827_s12 = sphi %s849_s12, %s13_s12  }
   0x2   : > { %p137_p1 = scmp.lt.s32.totalorder %s827_s12, 3 }
   0x4   : > { %p138_p2 = pnand %p564_p0, %p137_p1 }
   0x5   : > { %p161_p3 = scmp.lt.s32.totalorder (!%p138_p2), %s560_s13, 1 }
   0x6   : > { %141 = sbr.rel (%p138_p2) target bundleno = 55 (0x37), region = 32 }
   0xb   : > { %s996_s13 = smov (!%p161_p3, %s560_s13), 1  ;;  %v569_v40 = vld [vmem:[%s992_s1] ss:$0 sm:$0xff] }
   0xc   : > { %s605_s14 = sshll.u32 %s996_s13, 7 }
   0xd   : > { %s865_s17 = scalar_lea.vmem %s991_s0, %s605_s14  ;;  %s932_s24 = scalar_lea.vmem %s994_s3, %s605_s14 }
   0xe   : > { %v640_v0 = vld [vmem:[%s865_s17] sm:$0xff]   ;;  %v783_v1 = vld [vmem:[%s865_s17 + $0x8] sm:$0xff]   ;;  %v784_v2 = vld [vmem:[%s865_s17 + $0x10] sm:$0xff]  }
   0xf   : > { %v641_v3 = vunpack.c.l.bf16 %v640_v0  ;;  %v642_v4 = vunpack.c.h.bf16 %v640_v0  ;;  %v645_v5 = vunpack.c.l.bf16 %v783_v1  ;;  %v646_v6 = vunpack.c.h.bf16 %v783_v1  ;;  %v785_v7 = vld [vmem:[%s865_s17 + $0x18] sm:$0xff]   ;;  %v786_v8 = vld [vmem:[%s865_s17 + $0x20] sm:$0xff]   ;;  %v787_v9 = vld [vmem:[%s865_s17 + $0x28] sm:$0xff]  }
  0x10   : > { %v649_v10 = vunpack.c.l.bf16 %v784_v2  ;;  %v650_v11 = vunpack.c.h.bf16 %v784_v2  ;;  %v653_v12 = vunpack.c.l.bf16 %v785_v7  ;;  %v654_v13 = vunpack.c.h.bf16 %v785_v7  ;;  %v788_v14 = vld [vmem:[%s865_s17 + $0x30] sm:$0xff]   ;;  %v789_v15 = vld [vmem:[%s865_s17 + $0x38] sm:$0xff]   ;;  %v790_v16 = vld [vmem:[%s865_s17 + $0x40] sm:$0xff]  }
  0x11   : > { %v657_v17 = vunpack.c.l.bf16 %v786_v8  ;;  %v658_v18 = vunpack.c.h.bf16 %v786_v8  ;;  %v661_v19 = vunpack.c.l.bf16 %v787_v9  ;;  %v662_v20 = vunpack.c.h.bf16 %v787_v9  ;;  %v791_v21 = vld [vmem:[%s865_s17 + $0x48] sm:$0xff]   ;;  %v792_v22 = vld [vmem:[%s865_s17 + $0x50] sm:$0xff]   ;;  %v793_v23 = vld [vmem:[%s865_s17 + $0x58] sm:$0xff]  }
  0x12   : > { %v665_v24 = vunpack.c.l.bf16 %v788_v14  ;;  %v666_v25 = vunpack.c.h.bf16 %v788_v14  ;;  %v669_v26 = vunpack.c.l.bf16 %v789_v15  ;;  %v670_v27 = vunpack.c.h.bf16 %v789_v15  ;;  %v794_v28 = vld [vmem:[%s865_s17 + $0x60] sm:$0xff]   ;;  %v795_v29 = vld [vmem:[%s865_s17 + $0x68] sm:$0xff]   ;;  %v796_v34 = vld [vmem:[%s865_s17 + $0x70] sm:$0xff]  }
  0x13   : > { %v673_v30 = vunpack.c.l.bf16 %v790_v16  ;;  %v674_v31 = vunpack.c.h.bf16 %v790_v16  ;;  %v677_v32 = vunpack.c.l.bf16 %v791_v21  ;;  %v678_v33 = vunpack.c.h.bf16 %v791_v21  ;;  %v797_v35 = vld [vmem:[%s865_s17 + $0x78] sm:$0xff]   ;;  %v901_v9 = vld [vmem:[%s993_s2] ss:$0 sm:$0xff] }
  0x14   : > { %v681_v36 = vunpack.c.l.bf16 %v792_v22  ;;  %v682_v37 = vunpack.c.h.bf16 %v792_v22  ;;  %v685_v38 = vunpack.c.l.bf16 %v793_v23  ;;  %v686_v39 = vunpack.c.h.bf16 %v793_v23 }
  0x15   : > { %v689_v41 = vunpack.c.l.bf16 %v794_v28  ;;  %v690_v42 = vunpack.c.h.bf16 %v794_v28  ;;  %v693_v43 = vunpack.c.l.bf16 %v795_v29  ;;  %v694_v44 = vunpack.c.h.bf16 %v795_v29 }
  0x16   : > { %v697_v45 = vunpack.c.l.bf16 %v796_v34  ;;  %v698_v46 = vunpack.c.h.bf16 %v796_v34  ;;  %v701_v47 = vunpack.c.l.bf16 %v797_v35  ;;  %v702_v48 = vunpack.c.h.bf16 %v797_v35 }
  0x17   : > { %v242_v49 = vmul.f32 %v641_v3, %v569_v40  ;;  %v243_v50 = vmul.f32 %v642_v4, %v569_v40  ;;  %v244_v51 = vmul.f32 %v645_v5, %v569_v40  ;;  %v245_v52 = vmul.f32 %v646_v6, %v569_v40 }
  0x18   : > { %v246_v53 = vmul.f32 %v649_v10, %v569_v40  ;;  %v247_v54 = vmul.f32 %v650_v11, %v569_v40  ;;  %v248_v55 = vmul.f32 %v653_v12, %v569_v40  ;;  %v249_v56 = vmul.f32 %v654_v13, %v569_v40 }
  0x19   : > { %v250_v57 = vmul.f32 %v657_v17, %v569_v40  ;;  %v251_v58 = vmul.f32 %v658_v18, %v569_v40  ;;  %v252_v59 = vmul.f32 %v661_v19, %v569_v40  ;;  %v253_v60 = vmul.f32 %v662_v20, %v569_v40 }
  0x1a   : > { %v254_v61 = vmul.f32 %v665_v24, %v569_v40  ;;  %v255_v62 = vmul.f32 %v666_v25, %v569_v40  ;;  %v256_v63 = vmul.f32 %v669_v26, %v569_v40  ;;  %v257_v0 = vmul.f32 %v670_v27, %v569_v40 }
  0x1b   : > { %v258_v1 = vmul.f32 %v673_v30, %v569_v40  ;;  %v259_v2 = vmul.f32 %v674_v31, %v569_v40  ;;  %v886_v7 = vmul.f32 %v677_v32, %v569_v40  ;;  %v888_v3 = vmul.f32 %v678_v33, %v569_v40 }
  0x1c   : > { %v890_v4 = vmul.f32 %v681_v36, %v569_v40  ;;  %v892_v5 = vmul.f32 %v682_v37, %v569_v40  ;;  %v894_v6 = vmul.f32 %v685_v38, %v569_v40  ;;  %v896_v8 = vmul.f32 %v686_v39, %v569_v40 }
  0x1d   : > { %v903_v10 = vmul.f32 %v689_v41, %v569_v40  ;;  %v905_v11 = vmul.f32 %v690_v42, %v569_v40  ;;  %v907_v12 = vmul.f32 %v693_v43, %v569_v40  ;;  %v909_v13 = vmul.f32 %v694_v44, %v569_v40 }
  0x1e   : > { %v911_v14 = vmul.f32 %v697_v45, %v569_v40  ;;  %v913_v15 = vmul.f32 %v698_v46, %v569_v40  ;;  %v915_v16 = vmul.f32 %v701_v47, %v569_v40  ;;  %v917_v17 = vmul.f32 %v702_v48, %v569_v40 }
  0x1f   : > { %v281_v18 = vadd.f32 %v901_v9, %v242_v49  ;;  %v282_v19 = vadd.f32 %v901_v9, %v243_v50  ;;  %v283_v20 = vadd.f32 %v901_v9, %v244_v51  ;;  %v284_v21 = vadd.f32 %v901_v9, %v245_v52 }
  0x20   : > { %v285_v22 = vadd.f32 %v901_v9, %v246_v53  ;;  %v286_v23 = vadd.f32 %v901_v9, %v247_v54  ;;  %v287_v24 = vadd.f32 %v901_v9, %v248_v55  ;;  %v288_v25 = vadd.f32 %v901_v9, %v249_v56 }
  0x21   : > { %v313_v26 = vmax.f32 %v281_v18, 0.0  ;;  %v314_v27 = vmax.f32 %v282_v19, 0.0  ;;  %v315_v28 = vmax.f32 %v283_v20, 0.0  ;;  %v316_v29 = vmax.f32 %v284_v21, 0.0 }
  0x22   : > { %v317_v30 = vmax.f32 %v285_v22, 0.0  ;;  %v318_v31 = vmax.f32 %v286_v23, 0.0  ;;  %v319_v32 = vmax.f32 %v287_v24, 0.0  ;;  %v320_v33 = vmax.f32 %v288_v25, 0.0 }
  0x23   : > { %v706_v34 = vpack.c.bf16 %v314_v27, %v313_v26  ;;  %v711_v35 = vpack.c.bf16 %v316_v29, %v315_v28  ;;  %v289_v36 = vadd.f32 %v901_v9, %v250_v57  ;;  %v290_v37 = vadd.f32 %v901_v9, %v251_v58 }
  0x24   : > { %v716_v38 = vpack.c.bf16 %v318_v31, %v317_v30  ;;  %v721_v39 = vpack.c.bf16 %v320_v33, %v319_v32  ;;  %v291_v40 = vadd.f32 %v901_v9, %v252_v59  ;;  %v292_v41 = vadd.f32 %v901_v9, %v253_v60 }
  0x25   : > { %707 = vst [vmem:[%s932_s24] sm:$0xff] %v706_v34   ;;  %798 = vst [vmem:[%s932_s24 + $0x8] sm:$0xff] %v711_v35   ;;  %v321_v42 = vmax.f32 %v289_v36, 0.0  ;;  %v322_v43 = vmax.f32 %v290_v37, 0.0  ;;  %v293_v44 = vadd.f32 %v901_v9, %v254_v61  ;;  %v294_v45 = vadd.f32 %v901_v9, %v255_v62 }
  0x26   : > { %799 = vst [vmem:[%s932_s24 + $0x10] sm:$0xff] %v716_v38   ;;  %800 = vst [vmem:[%s932_s24 + $0x18] sm:$0xff] %v721_v39   ;;  %v323_v46 = vmax.f32 %v291_v40, 0.0  ;;  %v324_v47 = vmax.f32 %v292_v41, 0.0  ;;  %v295_v48 = vadd.f32 %v901_v9, %v256_v63  ;;  %v296_v49 = vadd.f32 %v901_v9, %v257_v0 }
  0x27   : > { %v726_v50 = vpack.c.bf16 %v322_v43, %v321_v42  ;;  %v325_v51 = vmax.f32 %v293_v44, 0.0  ;;  %v326_v52 = vmax.f32 %v294_v45, 0.0  ;;  %v297_v53 = vadd.f32 %v901_v9, %v258_v1 }
  0x28   : > { %v731_v54 = vpack.c.bf16 %v324_v47, %v323_v46  ;;  %v327_v55 = vmax.f32 %v295_v48, 0.0  ;;  %v328_v56 = vmax.f32 %v296_v49, 0.0  ;;  %v298_v57 = vadd.f32 %v901_v9, %v259_v2 }
  0x29   : > { %801 = vst [vmem:[%s932_s24 + $0x20] sm:$0xff] %v726_v50   ;;  %v736_v58 = vpack.c.bf16 %v326_v52, %v325_v51  ;;  %v329_v59 = vmax.f32 %v297_v53, 0.0  ;;  %v299_v60 = vadd.f32 %v901_v9, %v886_v7  ;;  %v300_v61 = vadd.f32 %v901_v9, %v888_v3 }
  0x2a   : > { %802 = vst [vmem:[%s932_s24 + $0x28] sm:$0xff] %v731_v54   ;;  %v741_v62 = vpack.c.bf16 %v328_v56, %v327_v55  ;;  %v330_v63 = vmax.f32 %v298_v57, 0.0  ;;  %v301_v0 = vadd.f32 %v901_v9, %v890_v4  ;;  %v302_v1 = vadd.f32 %v901_v9, %v892_v5 }
  0x2b   : > { %803 = vst [vmem:[%s932_s24 + $0x30] sm:$0xff] %v736_v58   ;;  %v331_v2 = vmax.f32 %v299_v60, 0.0  ;;  %v332_v18 = vmax.f32 %v300_v61, 0.0  ;;  %v303_v19 = vadd.f32 %v901_v9, %v894_v6  ;;  %v304_v7 = vadd.f32 %v901_v9, %v896_v8 }
  0x2c   : > { %804 = vst [vmem:[%s932_s24 + $0x38] sm:$0xff] %v741_v62   ;;  %v746_v3 = vpack.c.bf16 %v330_v63, %v329_v59  ;;  %v333_v20 = vmax.f32 %v301_v0, 0.0  ;;  %v334_v21 = vmax.f32 %v302_v1, 0.0  ;;  %v305_v4 = vadd.f32 %v901_v9, %v903_v10 }
  0x2d   : > { %v751_v22 = vpack.c.bf16 %v332_v18, %v331_v2  ;;  %v335_v5 = vmax.f32 %v303_v19, 0.0  ;;  %v336_v23 = vmax.f32 %v304_v7, 0.0  ;;  %v306_v24 = vadd.f32 %v901_v9, %v905_v11 }
  0x2e   : > { %805 = vst [vmem:[%s932_s24 + $0x40] sm:$0xff] %v746_v3   ;;  %v756_v6 = vpack.c.bf16 %v334_v21, %v333_v20  ;;  %v337_v25 = vmax.f32 %v305_v4, 0.0  ;;  %v307_v8 = vadd.f32 %v901_v9, %v907_v12  ;;  %v308_v26 = vadd.f32 %v901_v9, %v909_v13 }
  0x2f   : > { %806 = vst [vmem:[%s932_s24 + $0x48] sm:$0xff] %v751_v22   ;;  %v761_v27 = vpack.c.bf16 %v336_v23, %v335_v5  ;;  %v338_v10 = vmax.f32 %v306_v24, 0.0  ;;  %v309_v28 = vadd.f32 %v901_v9, %v911_v14  ;;  %v310_v11 = vadd.f32 %v901_v9, %v913_v15 }
  0x30   : > { %807 = vst [vmem:[%s932_s24 + $0x50] sm:$0xff] %v756_v6   ;;  %v339_v29 = vmax.f32 %v307_v8, 0.0  ;;  %v340_v30 = vmax.f32 %v308_v26, 0.0  ;;  %v311_v12 = vadd.f32 %v901_v9, %v915_v16  ;;  %v312_v13 = vadd.f32 %v901_v9, %v917_v17 }
  0x31   : > { %808 = vst [vmem:[%s932_s24 + $0x58] sm:$0xff] %v761_v27   ;;  %v766_v31 = vpack.c.bf16 %v338_v10, %v337_v25  ;;  %v341_v32 = vmax.f32 %v309_v28, 0.0  ;;  %v342_v33 = vmax.f32 %v310_v11, 0.0 }
  0x32   : > { %v771_v14 = vpack.c.bf16 %v340_v30, %v339_v29  ;;  %v343_v34 = vmax.f32 %v311_v12, 0.0  ;;  %v344_v35 = vmax.f32 %v312_v13, 0.0 }
  0x33   : > { %809 = vst [vmem:[%s932_s24 + $0x60] sm:$0xff] %v766_v31   ;;  %v776_v15 = vpack.c.bf16 %v342_v33, %v341_v32 }
  0x34   : > { %810 = vst [vmem:[%s932_s24 + $0x68] sm:$0xff] %v771_v14   ;;  %v781_v36 = vpack.c.bf16 %v344_v35, %v343_v34 }
  0x35   : > { %811 = vst [vmem:[%s932_s24 + $0x70] sm:$0xff] %v776_v15  }
  0x36   : > { %812 = vst [vmem:[%s932_s24 + $0x78] sm:$0xff] %v781_v36  }
  0x37 PF: > { %s13_s12 = sadd.s32 1, %s827_s12  }
  0x38   : > { %p10_p4 = scmp.ge.s32.totalorder %s13_s12, 4  }
  0x3a   :  { %12 = sbr.rel (!%p10_p4) target bundleno = 1 (0x1), region = 62 }

// kernel: conv_transpose2d_block.2
= control target key start
LH: loop header
LB: loop body
LE: loop exit
PB: predicated region body
PF: predicated region fallthrough
CT: control target
= control target key end

     0   :  { %s1241_s12 = smov 0   ;;  %s1420_s0 = inlined_call_operand.vmem [shape: bf16[2,256,72], index: 0, kind: input, shape index: {}]   ;;  %s1421_s1 = inlined_call_operand.vmem [shape: bf16[72,128], index: 1, kind: input, shape index: {}]   ;;  %s1422_s2 = inlined_call_operand.vmem [shape: bf16[2,256,128], index: 2, kind: output, shape index: {0}]   ;;  %s1423_s3 = inlined_call_operand.vmem [shape: f32[2,2,128], index: 3, kind: output, shape index: {1}]  }
   0x1 LB: > { %s899_s13 = sadd.s32 4294967295, %s1219_s12   ;;  %p903_p0 = scmp.ge.s32.totalorder %s1219_s12, 1  ;;  %s1219_s12 = sphi %s1241_s12, %s14_s12  }
   0x2   : > { %p140_p1 = scmp.lt.s32.totalorder %s1219_s12, 3 }
   0x4   : > { %p141_p2 = pnand %p903_p0, %p140_p1 }
   0x5   : > { %p168_p3 = scmp.lt.s32.totalorder (!%p141_p2), %s899_s13, 1 }
   0x6   : > { %144 = sbr.rel (%p141_p2) target bundleno = 308 (0x134), region = 28 }
   0xb   : > { %v1192_v0 = vld [vmem:[%s1421_s1 + $0x20] ss:$0 sps:$4 sm:$0xff]   ;;  %vm380_vm0 = vcmask 1043456   ;;  %v1193_v1 = vld [vmem:[%s1421_s1 + $0x18] sm:$0xff]   ;;  %v1194_v3 = vld [vmem:[%s1421_s1 + $0x10] sm:$0xff]   ;;  %s1425_s13 = smov (!%p168_p3, %s899_s13), 1 }
   0xc   : > { %1182 = vmatprep.subr.msk.bf16.mxu0 %vm380_vm0, %v1192_v0  ;;  %v382_v2 = vsel %vm380_vm0, %v1192_v0, 0  ;;  %1183 = vmatprep.subr.msk.bf16.mxu1 %vm380_vm0, %v1192_v0  ;;  %s980_s20 = sshll.u32 %s1425_s13, 7  ;;  %v1195_v4 = vld [vmem:[%s1421_s1 + $0x8] sm:$0xff]   ;;  %vm331_vm1 = vcmask 588800   ;;  %v1196_v6 = vld [vmem:[%s1421_s1] sm:$0xff]   ;;  %s908_s4 = sshll.u32 %s1425_s13, 1 }
   0xd   : > { %1131 = vmatpush3.bf16.msra.mxu0 %v382_v2  ;;  %1177 = vmatpush3.bf16.msra.mxu1 %v382_v2  ;;  %s1269_s25 = scalar_lea.vmem %s1420_s0, %s980_s20  ;;  %s1315_s30 = scalar_lea.vmem %s1422_s2, %s980_s20 }
   0xe   : > { %1132 = vmatprep.subr.bf16.mxu0 %v1193_v1  ;;  %1173 = vmatprep.subr.bf16.mxu1 %v1193_v1  ;;  %v1197_v5 = vld [vmem:[%s1269_s25] sm:$0xff]   ;;  %v1198_v7 = vld [vmem:[%s1269_s25 + $0x8] sm:$0xff]   ;;  %v1199_v9 = vld [vmem:[%s1269_s25 + $0x10] sm:$0xff]   ;;  %s181_s7 = scalar_lea.vmem %s1423_s3, %s908_s4 }
   0xf   : > { %1140 = vmatprep.mubr.msk.bf16.mxu0 %vm331_vm1, %v1197_v5  ;;  %v1205_v8 = vld [vmem:[%s1269_s25 + $0x40] sm:$0xff]   ;;  %v1206_v10 = vld [vmem:[%s1269_s25 + $0x48] sm:$0xff]   ;;  %v1207_v11 = vld [vmem:[%s1269_s25 + $0x50] sm:$0xff]  }
  0x10   : > { %1156 = vmatprep.mubr.msk.bf16.mxu1 %vm331_vm1, %v1205_v8  ;;  %v1200_v12 = vld [vmem:[%s1269_s25 + $0x18] sm:$0xff]   ;;  %v1201_v13 = vld [vmem:[%s1269_s25 + $0x20] sm:$0xff]   ;;  %v1202_v16 = vld [vmem:[%s1269_s25 + $0x28] sm:$0xff]  }
  0x11   : > { %1133 = vmatpush3.bf16.msra.mxu0 %v1193_v1  ;;  %1178 = vmatpush3.bf16.msra.mxu1 %v1193_v1  ;;  %v1208_v14 = vld [vmem:[%s1269_s25 + $0x58] sm:$0xff]   ;;  %v1209_v15 = vld [vmem:[%s1269_s25 + $0x60] sm:$0xff]   ;;  %v1203_v17 = vld [vmem:[%s1269_s25 + $0x30] sm:$0xff]  }
  0x12   : > { %1134 = vmatprep.subr.bf16.mxu0 %v1194_v3  ;;  %1174 = vmatprep.subr.bf16.mxu1 %v1194_v3  ;;  %v1210_v18 = vld [vmem:[%s1269_s25 + $0x68] sm:$0xff]   ;;  %v1211_v19 = vld [vmem:[%s1269_s25 + $0x70] sm:$0xff]   ;;  %v1204_v20 = vld [vmem:[%s1269_s25 + $0x38] sm:$0xff]  }
  0x13   : > { %v1212_v21 = vld [vmem:[%s1269_s25 + $0x78] sm:$0xff]  }
  0x15   : > { %1135 = vmatpush3.bf16.msra.mxu0 %v1194_v3  ;;  %1179 = vmatpush3.bf16.msra.mxu1 %v1194_v3 }
  0x16   : > { %1136 = vmatprep.subr.bf16.mxu0 %v1195_v4  ;;  %1175 = vmatprep.subr.bf16.mxu1 %v1195_v4 }
  0x19   : > { %1137 = vmatpush3.bf16.msra.mxu0 %v1195_v4  ;;  %1180 = vmatpush3.bf16.msra.mxu1 %v1195_v4 }
  0x1a   : > { %1138 = vmatprep.subr.bf16.mxu0 %v1196_v6  ;;  %1176 = vmatprep.subr.bf16.mxu1 %v1196_v6 }
  0x1d   : > { %1139 = vmatpush3.bf16.msra.mxu0 %v1196_v6  ;;  %1181 = vmatpush3.bf16.msra.mxu1 %v1196_v6 }
  0x20   : > { %1141 = vmatmul.mubr.msk.bf16.vlgmr.msra.gmra.mxu0 %vm331_vm1, %v1198_v7  ;;  %1157 = vmatmul.mubr.msk.bf16.vlgmr.msra.gmra.mxu1 %vm331_vm1, %v1206_v10 }
  0x21   : > { %1144 = vmatprep.mubr.msk.bf16.mxu0 %vm331_vm1, %v1199_v9  ;;  %1160 = vmatprep.mubr.msk.bf16.mxu1 %vm331_vm1, %v1207_v11 }
  0x28   : > { %1145 = vmatmul.mubr.msk.bf16.gmra.mxu0 %vm331_vm1, %v1200_v12  ;;  %1161 = vmatmul.mubr.msk.bf16.gmra.mxu1 %vm331_vm1, %v1208_v14 }
  0x29   : > { %1148 = vmatprep.mubr.msk.bf16.mxu0 %vm331_vm1, %v1201_v13  ;;  %1164 = vmatprep.mubr.msk.bf16.mxu1 %vm331_vm1, %v1209_v15 }
  0x30   : > { %1149 = vmatmul.mubr.msk.bf16.gmra.mxu0 %vm331_vm1, %v1202_v16  ;;  %1165 = vmatmul.mubr.msk.bf16.gmra.mxu1 %vm331_vm1, %v1210_v18 }
  0x31   : > { %1152 = vmatprep.mubr.msk.bf16.mxu0 %vm331_vm1, %v1203_v17  ;;  %1168 = vmatprep.mubr.msk.bf16.mxu1 %vm331_vm1, %v1211_v19 }
  0x38   : > { %1153 = vmatmul.mubr.msk.bf16.gmra.mxu0 %vm331_vm1, %v1204_v20  ;;  %1169 = vmatmul.mubr.msk.bf16.gmra.mxu1 %vm331_vm1, %v1212_v21 }
  0xe0   : > { %v1142_v22 = vpop.f32.mrf.mxu0  ;;  %v1306_v23 = vpop.f32.mrf.mxu1 }
  0xe1   : > { %v585_v38 = vmul.f32 %v1142_v22, %v1142_v22 }
  0xe2   : > { %v418_v24 = vpop.f32.mrf.mxu0  ;;  %v1308_v25 = vpop.f32.mrf.mxu1 }
  0xe3   : > { %v583_v31 = vmul.f32 %v418_v24, %v418_v24 }
  0xe4   : > { %v1143_v26 = vpop.f32.mrf.mxu0  ;;  %v1317_v28 = vpop.f32.mrf.mxu1 }
  0xe5   : > { %v1022_v27 = vpack.c.bf16 %v1143_v26, %v1142_v22  ;;  %v1062_v30 = vpack.c.bf16 %v1317_v28, %v1306_v23  ;;  %v586_v43 = vmul.f32 %v1143_v26, %v1143_v26 }
  0xe6   : > { %v421_v29 = vpop.f32.mrf.mxu0  ;;  %v1322_v35 = vpop.f32.mrf.mxu1 }
  0xe7   : > { %1094 = vst [vmem:[%s1315_s30 + $0x8] sm:$0xff] %v1022_v27   ;;  %v545_v32 = vadd.f32 %v421_v29, %v418_v24  ;;  %v584_v33 = vmul.f32 %v421_v29, %v421_v29  ;;  %v1017_v34 = vpack.c.bf16 %v421_v29, %v418_v24  ;;  %1102 = vst [vmem:[%s1315_s30 + $0x48] sm:$0xff] %v1062_v30  }
  0xe8   : > { %v1146_v36 = vpop.f32.mrf.mxu0  ;;  %v1057_v37 = vpack.c.bf16 %v1322_v35, %v1308_v25  ;;  %v1328_v41 = vpop.f32.mrf.mxu1 }
  0xe9   : > { %v546_v39 = vadd.f32 %v1142_v22, %v545_v32  ;;  %v615_v40 = vadd.f32 %v584_v33, %v583_v31  ;;  %1018 = vst [vmem:[%s1315_s30] sm:$0xff] %v1017_v34   ;;  %v589_v62 = vmul.f32 %v1146_v36, %v1146_v36 }
  0xea   : > { %v434_v42 = vpop.f32.mrf.mxu0  ;;  %1101 = vst [vmem:[%s1315_s30 + $0x40] sm:$0xff] %v1057_v37   ;;  %v1331_v46 = vpop.f32.mrf.mxu1 }
  0xeb   : > { %v616_v44 = vadd.f32 %v615_v40, %v585_v38  ;;  %v547_v45 = vadd.f32 %v1143_v26, %v546_v39  ;;  %v587_v49 = vmul.f32 %v434_v42, %v434_v42 }
  0xec   : > { %v1147_v47 = vpop.f32.mrf.mxu0  ;;  %v1333_v52 = vpop.f32.mrf.mxu1 }
  0xed   : > { %v548_v48 = vadd.f32 %v547_v45, %v434_v42  ;;  %v617_v50 = vadd.f32 %v616_v44, %v586_v43  ;;  %v1032_v51 = vpack.c.bf16 %v1147_v47, %v1146_v36  ;;  %v1072_v54 = vpack.c.bf16 %v1333_v52, %v1328_v41 }
  0xee   : > { %v437_v53 = vpop.f32.mrf.mxu0  ;;  %v1338_v59 = vpop.f32.mrf.mxu1  ;;  %v590_v3 = vmul.f32 %v1147_v47, %v1147_v47 }
  0xef   : > { %v618_v55 = vadd.f32 %v617_v50, %v587_v49  ;;  %1096 = vst [vmem:[%s1315_s30 + $0x18] sm:$0xff] %v1032_v51   ;;  %v549_v56 = vadd.f32 %v548_v48, %v437_v53  ;;  %v588_v57 = vmul.f32 %v437_v53, %v437_v53  ;;  %v1027_v58 = vpack.c.bf16 %v437_v53, %v434_v42 }
  0xf0   : > { %v1150_v60 = vpop.f32.mrf.mxu0  ;;  %1104 = vst [vmem:[%s1315_s30 + $0x58] sm:$0xff] %v1072_v54   ;;  %v1067_v61 = vpack.c.bf16 %v1338_v59, %v1331_v46  ;;  %v1344_v1 = vpop.f32.mrf.mxu1 }
  0xf1   : > { %v550_v63 = vadd.f32 %v1146_v36, %v549_v56  ;;  %v619_v0 = vadd.f32 %v618_v55, %v588_v57  ;;  %1095 = vst [vmem:[%s1315_s30 + $0x10] sm:$0xff] %v1027_v58   ;;  %v593_v22 = vmul.f32 %v1150_v60, %v1150_v60  ;;  %v599_v58 = vmul.f32 %v1308_v25, %v1308_v25 }
  0xf2   : > { %v450_v2 = vpop.f32.mrf.mxu0  ;;  %1103 = vst [vmem:[%s1315_s30 + $0x50] sm:$0xff] %v1067_v61   ;;  %v1347_v6 = vpop.f32.mrf.mxu1 }
  0xf3   : > { %v620_v4 = vadd.f32 %v619_v0, %v589_v62  ;;  %v551_v5 = vadd.f32 %v1147_v47, %v550_v63  ;;  %v591_v9 = vmul.f32 %v450_v2, %v450_v2  ;;  %v600_v63 = vmul.f32 %v1322_v35, %v1322_v35 }
  0xf4   : > { %v1151_v7 = vpop.f32.mrf.mxu0  ;;  %v1349_v12 = vpop.f32.mrf.mxu1 }
  0xf5   : > { %v552_v8 = vadd.f32 %v551_v5, %v450_v2  ;;  %v621_v10 = vadd.f32 %v620_v4, %v590_v3  ;;  %v1042_v11 = vpack.c.bf16 %v1151_v7, %v1150_v60  ;;  %v1082_v14 = vpack.c.bf16 %v1349_v12, %v1344_v1 }
  0xf6   : > { %v453_v13 = vpop.f32.mrf.mxu0  ;;  %v1354_v19 = vpop.f32.mrf.mxu1  ;;  %v594_v30 = vmul.f32 %v1151_v7, %v1151_v7  ;;  %v602_v5 = vmul.f32 %v1317_v28, %v1317_v28 }
  0xf7   : > { %v622_v15 = vadd.f32 %v621_v10, %v591_v9  ;;  %1098 = vst [vmem:[%s1315_s30 + $0x28] sm:$0xff] %v1042_v11   ;;  %v553_v16 = vadd.f32 %v552_v8, %v453_v13  ;;  %v592_v17 = vmul.f32 %v453_v13, %v453_v13  ;;  %v1037_v18 = vpack.c.bf16 %v453_v13, %v450_v2 }
  0xf8   : > { %v1154_v20 = vpop.f32.mrf.mxu0  ;;  %1106 = vst [vmem:[%s1315_s30 + $0x68] sm:$0xff] %v1082_v14   ;;  %v1077_v21 = vpack.c.bf16 %v1354_v19, %v1347_v6  ;;  %v1360_v27 = vpop.f32.mrf.mxu1  ;;  %v601_v2 = vmul.f32 %v1306_v23, %v1306_v23  ;;  %v603_v9 = vmul.f32 %v1331_v46, %v1331_v46  ;;  %v604_v13 = vmul.f32 %v1338_v59, %v1338_v59 }
  0xf9   : > { %v554_v24 = vadd.f32 %v1150_v60, %v553_v16  ;;  %v623_v26 = vadd.f32 %v622_v15, %v592_v17  ;;  %1097 = vst [vmem:[%s1315_s30 + $0x20] sm:$0xff] %v1037_v18   ;;  %v597_v51 = vmul.f32 %v1154_v20, %v1154_v20  ;;  %v607_v18 = vmul.f32 %v1347_v6, %v1347_v6 }
  0xfa   : > { %v466_v29 = vpop.f32.mrf.mxu0  ;;  %1105 = vst [vmem:[%s1315_s30 + $0x60] sm:$0xff] %v1077_v21   ;;  %v530_v33 = vpop.f32.mrf.mxu1 }
  0xfb   : > { %v624_v31 = vadd.f32 %v623_v26, %v593_v22  ;;  %v555_v32 = vadd.f32 %v1151_v7, %v554_v24  ;;  %v595_v37 = vmul.f32 %v466_v29, %v466_v29  ;;  %v608_v22 = vmul.f32 %v1354_v19, %v1354_v19 }
  0xfc   : > { %v1155_v34 = vpop.f32.mrf.mxu0  ;;  %v1363_v40 = vpop.f32.mrf.mxu1 }
  0xfd   : > { %v556_v36 = vadd.f32 %v555_v32, %v466_v29  ;;  %v625_v38 = vadd.f32 %v624_v31, %v594_v30  ;;  %v1052_v39 = vpack.c.bf16 %v1155_v34, %v1154_v20  ;;  %v1092_v43 = vpack.c.bf16 %v1363_v40, %v1360_v27 }
  0xfe   : > { %v469_v42 = vpop.f32.mrf.mxu0  ;;  %v533_v49 = vpop.f32.mrf.mxu1  ;;  %v598_v55 = vmul.f32 %v1155_v34, %v1155_v34  ;;  %v611_v31 = vmul.f32 %v530_v33, %v530_v33 }
  0xff   : > { %v626_v44 = vadd.f32 %v625_v38, %v595_v37  ;;  %1100 = vst [vmem:[%s1315_s30 + $0x38] sm:$0xff] %v1052_v39   ;;  %v557_v45 = vadd.f32 %v556_v36, %v469_v42  ;;  %v596_v47 = vmul.f32 %v469_v42, %v469_v42  ;;  %v1047_v48 = vpack.c.bf16 %v469_v42, %v466_v29 }
 0x100   : > { %1108 = vst [vmem:[%s1315_s30 + $0x78] sm:$0xff] %v1092_v43   ;;  %v1087_v50 = vpack.c.bf16 %v533_v49, %v530_v33  ;;  %v612_v37 = vmul.f32 %v533_v49, %v533_v49  ;;  %v614_v39 = vmul.f32 %v1363_v40, %v1363_v40 }
 0x101   : > { %v558_v53 = vadd.f32 %v1154_v20, %v557_v45  ;;  %v627_v54 = vadd.f32 %v626_v44, %v596_v47  ;;  %1099 = vst [vmem:[%s1315_s30 + $0x30] sm:$0xff] %v1047_v48  }
 0x102   : > { %1107 = vst [vmem:[%s1315_s30 + $0x70] sm:$0xff] %v1087_v50  }
 0x103   : > { %v559_v56 = vadd.f32 %v1155_v34, %v558_v53  ;;  %v628_v57 = vadd.f32 %v627_v54, %v597_v51 }
 0x105   : > { %v629_v60 = vadd.f32 %v628_v57, %v598_v55  ;;  %v560_v61 = vadd.f32 %v559_v56, %v1308_v25 }
 0x107   : > { %v561_v62 = vadd.f32 %v560_v61, %v1322_v35  ;;  %v630_v0 = vadd.f32 %v629_v60, %v599_v58 }
 0x109   : > { %v562_v3 = vadd.f32 %v1306_v23, %v561_v62  ;;  %v631_v4 = vadd.f32 %v630_v0, %v600_v63  ;;  %v605_v23 = vmul.f32 %v1328_v41, %v1328_v41 }
 0x10b   : > { %v632_v7 = vadd.f32 %v631_v4, %v601_v2  ;;  %v563_v8 = vadd.f32 %v1317_v28, %v562_v3  ;;  %v606_v28 = vmul.f32 %v1333_v52, %v1333_v52 }
 0x10d   : > { %v564_v25 = vadd.f32 %v563_v8, %v1331_v46  ;;  %v633_v10 = vadd.f32 %v632_v7, %v602_v5 }
 0x10f   : > { %v634_v35 = vadd.f32 %v633_v10, %v603_v9  ;;  %v565_v11 = vadd.f32 %v564_v25, %v1338_v59 }
 0x111   : > { %v566_v14 = vadd.f32 %v1328_v41, %v565_v11  ;;  %v635_v15 = vadd.f32 %v634_v35, %v604_v13  ;;  %v609_v41 = vmul.f32 %v1344_v1, %v1344_v1 }
 0x113   : > { %v636_v16 = vadd.f32 %v635_v15, %v605_v23  ;;  %v567_v17 = vadd.f32 %v1333_v52, %v566_v14  ;;  %v610_v52 = vmul.f32 %v1349_v12, %v1349_v12 }
 0x115   : > { %v568_v46 = vadd.f32 %v567_v17, %v1347_v6  ;;  %v637_v20 = vadd.f32 %v636_v16, %v606_v28 }
 0x117   : > { %v638_v21 = vadd.f32 %v637_v20, %v607_v18  ;;  %v569_v59 = vadd.f32 %v568_v46, %v1354_v19  ;;  %v613_v19 = vmul.f32 %v1360_v27, %v1360_v27 }
 0x119   : > { %v570_v24 = vadd.f32 %v1344_v1, %v569_v59  ;;  %v639_v26 = vadd.f32 %v638_v21, %v608_v22 }
 0x11b   : > { %v640_v29 = vadd.f32 %v639_v26, %v609_v41  ;;  %v571_v30 = vadd.f32 %v1349_v12, %v570_v24 }
 0x11d   : > { %v572_v6 = vadd.f32 %v571_v30, %v530_v33  ;;  %v641_v32 = vadd.f32 %v640_v29, %v610_v52 }
 0x11f   : > { %v642_v34 = vadd.f32 %v641_v32, %v611_v31  ;;  %v573_v36 = vadd.f32 %v572_v6, %v533_v49 }
 0x121   : > { %v574_v38 = vadd.f32 %v1360_v27, %v573_v36  ;;  %v643_v1 = vadd.f32 %v642_v34, %v612_v37 }
 0x123   : > { %v575_v42 = vadd.f32 %v1363_v40, %v574_v38  ;;  %v644_v43 = vadd.f32 %v643_v1, %v613_v19 }
 0x125   : > { %v576_v12 = vrot.slane %v575_v42, 4  ;;  %v645_v44 = vadd.f32 %v644_v43, %v614_v39 }
 0x127   : > { %v577_v33 = vadd.f32 %v576_v12, %v575_v42  ;;  %v646_v45 = vrot.slane %v645_v44, 4 }
 0x129   : > { %v578_v47 = vrot.slane %v577_v33, 2  ;;  %v647_v48 = vadd.f32 %v646_v45, %v645_v44 }
 0x12b   : > { %v579_v49 = vadd.f32 %v578_v47, %v577_v33  ;;  %v648_v50 = vrot.slane %v647_v48, 2 }
 0x12d   : > { %v580_v51 = vrot.slane %v579_v49, 1  ;;  %v649_v53 = vadd.f32 %v648_v50, %v647_v48 }
 0x12f   : > { %v581_v27 = vadd.f32 %v580_v51, %v579_v49  ;;  %v650_v54 = vrot.slane %v649_v53, 1 }
 0x131   : > { %582 = vst [vmem:[%s181_s7] sm:$0x1] %v581_v27  ;;  %v651_v40 = vadd.f32 %v650_v54, %v649_v53 }
 0x133   : > { %652 = vst [vmem:[%s181_s7 + $0x1] sm:$0x1] %v651_v40 }
 0x134 PF: > { %s14_s12 = sadd.s32 1, %s1219_s12  }
 0x135   : > { %p11_p4 = scmp.ge.s32.totalorder %s14_s12, 4  }
 0x137   :  { %13 = sbr.rel (!%p11_p4) target bundleno = 1 (0x1), region = 70 }

</bundles_post_ra>
